<compile_context>
chip_gen: v7x
topology: tpu7x:2x2x1
jax: 0.10.0
libtpu: 0.0.40
codegen_flags: <defaults>
</compile_context>

<pallas_src>
import functools
import math

import jax
import jax.numpy as jnp
from jax.experimental import pallas as pl
from jax.experimental.pallas import tpu as pltpu


def _activate(v, activation):
    """Activation on an (n_out, cols) tile; channels are on the sublane axis."""
    if activation == "linear":
        return v
    elif activation == "relu":
        return jnp.maximum(v, 0.0)
    elif activation == "sigmoid":
        return jax.nn.sigmoid(v)
    elif activation == "softmax":
        # PyTorch softmax(dim=1) is over channels == axis 0 of (n_out, cols).
        m = jnp.max(v, axis=0, keepdims=True)
        e = jnp.exp(v - m)
        inv = pl.reciprocal(jnp.sum(e, axis=0, keepdims=True), approx=False)
        return e * inv
    else:
        raise ValueError(f"unknown activation: {activation}")


def attention_kernel(x_ref, w_ref, b_ref, sel_ref, pooled_ref, cla_ref, *,
                     n_out, att_activation, cla_activation):
    # x_ref:      (n_in, cols)    bf16, cols = bt*T, columns are (batch, time)
    # w_ref:      (2*n_out, n_in) bf16  [w_att; w_cla], resident across grid
    # b_ref:      (2*n_out, 1)    f32, resident
    # sel_ref:    (cols, bt)      f32 block-diagonal segment-sum selector
    # pooled_ref: (1, bt, n_out)  f32 per-step pooled rows
    # cla_ref:    (n_out, cols)   f32 lane-dense cla writeback
    eps = 1e-07

    # Fused att+cla 1x1 convs: one MXU matmul per grid step (bf16 in, f32 acc),
    # bias broadcast added once per step.
    y = jnp.dot(w_ref[...], x_ref[...],
                preferred_element_type=jnp.float32) + b_ref[...]   # (2*n_out, cols)

    att = _activate(y[:n_out, :], att_activation)                  # (n_out, cols)
    cla = _activate(y[n_out:, :], cla_activation)                  # (n_out, cols)

    # Lane-dense cla store (cols is a multiple of 128 whenever possible).
    cla_ref[...] = cla.astype(cla_ref.dtype)

    att = jnp.clip(att, eps, 1.0 - eps)

    # Per-batch-element time reductions via a tiny selector matmul on the MXU:
    # column r belongs to local batch r // T  =>  sel[r, c] = (r // T == c).
    sel = sel_ref[...]                                             # (cols, bt)
    num = jnp.dot(att * cla, sel, preferred_element_type=jnp.float32)  # (n_out, bt)
    den = jnp.dot(att, sel, preferred_element_type=jnp.float32)        # (n_out, bt)

    # pooled = sum_t(att*cla) / sum_t(att); denom >= T*eps so approx rcp is safe.
    pooled = num * pl.reciprocal(den, approx=True)                 # (n_out, bt)
    pooled_ref[0] = jnp.transpose(pooled).astype(pooled_ref.dtype)  # (bt, n_out)


def _pick_bt(B, T, n_in, n_out, budget_bytes=16 << 20):
    """Batch elements per grid step.

    Preferences (per perf review):
      * bt*T must be a multiple of 128 unless the block covers all of B*T
        (Mosaic last-two-dims block rule).
      * double-buffered per-step footprint stays under `budget_bytes`
        (conservative enough for v5e's 16 MiB scoped default and v7x's 64 MiB
        physical VMEM).
      * prefer >= 4 grid steps (2 per v7x TensorCore for DMA double-buffering),
        then lane-dense / larger column blocks.
    """
    # TODO(synk): for very large B*T where only the nsteps==1 block satisfies
    # the 128-lane rule, add a column grid axis with VMEM accumulators for the
    # segment sums instead of one whole-row block.
    best_bt, best_key = B, None
    for bt in range(1, B + 1):
        if B % bt:
            continue
        nsteps = B // bt
        cols = bt * T
        if cols % 128 != 0 and nsteps != 1:
            continue  # would violate the last-dim block constraint
        # double-buffered bf16 x block + f32 cla block (+ tiny pooled block)
        foot = 2 * (n_in * cols * 2 + n_out * cols * 4 + bt * n_out * 4)
        key = (foot <= budget_bytes, min(nsteps, 4), cols % 128 == 0,
               min(cols, 2048), nsteps)
        if best_key is None or key > best_key:
            best_bt, best_key = bt, key
    return best_bt


def attention_forward(x_nchw, w_att, b_att, w_cla, b_cla,
                      att_activation="sigmoid", cla_activation="softmax"):
    """x_nchw: (B, n_in, T, 1) float32 (PyTorch NCHW convention).

    w_att, w_cla: (n_out, n_in) (PyTorch conv weight squeezed); biases (n_out,).
    Returns (pooled (B, n_out), cla (B, n_out, T)), both float32.
    """
    B, n_in, T, W = x_nchw.shape
    assert W == 1
    n_out = w_att.shape[0]

    bt = _pick_bt(B, T, n_in, n_out)
    nsteps = B // bt
    cols = bt * T

    # One-time wrapper layout of x: (B, n_in, T, 1) -> (n_in, B*T), bf16.
    # XLA fuses the transpose with the bf16 cast into a single pass over x.
    x_flat = jnp.transpose(x_nchw[..., 0], (1, 0, 2)).reshape(n_in, B * T)
    x_flat = x_flat.astype(jnp.bfloat16)

    # Fuse the two 1x1 convs into one (2*n_out, n_in) weight block (bf16).
    w_both = jnp.concatenate([w_att, w_cla], axis=0).astype(jnp.bfloat16)
    b_both = jnp.concatenate([b_att, b_cla], axis=0).reshape(2 * n_out, 1)
    b_both = b_both.astype(jnp.float32)

    # Block-diagonal segment-sum selector (resident in VMEM).
    sel = (jnp.arange(cols)[:, None] // T ==
           jnp.arange(bt)[None, :]).astype(jnp.float32)

    # Explicit VMEM budget (v5e scoped default is only 16 MiB).
    blk_bytes = 2 * (n_in * cols * 2 + n_out * cols * 4 + bt * n_out * 4)
    res_bytes = 2 * (2 * n_out * n_in * 2 + 2 * n_out * 4 + cols * bt * 4)
    vmem_limit = int(max(16 << 20, min(64 << 20,
                                       4 * (blk_bytes + res_bytes) + (2 << 20))))

    kernel = functools.partial(
        attention_kernel,
        n_out=n_out,
        att_activation=att_activation,
        cla_activation=cla_activation,
    )

    pooled3, cla_flat = pl.pallas_call(
        kernel,
        out_shape=(
            jax.ShapeDtypeStruct((nsteps, bt, n_out), jnp.float32),
            jax.ShapeDtypeStruct((n_out, B * T), jnp.float32),
        ),
        grid_spec=pltpu.PrefetchScalarGridSpec(
            num_scalar_prefetch=0,
            grid=(nsteps,),
            in_specs=[
                pl.BlockSpec((n_in, cols), lambda i: (0, i)),
                pl.BlockSpec((2 * n_out, n_in), lambda i: (0, 0)),
                pl.BlockSpec((2 * n_out, 1), lambda i: (0, 0)),
                pl.BlockSpec((cols, bt), lambda i: (0, 0)),
            ],
            out_specs=[
                pl.BlockSpec((1, bt, n_out), lambda i: (i, 0, 0)),
                pl.BlockSpec((n_out, cols), lambda i: (0, i)),
            ],
        ),
        compiler_params=pltpu.CompilerParams(
            dimension_semantics=("parallel",),
            vmem_limit_bytes=vmem_limit),
    )(x_flat, w_both, b_both, sel)

    # Tiny fixups: pooled is already row-major (B, n_out); cla needs one small
    # (n_out, B, T) -> (B, n_out, T) pass to match the PyTorch output layout.
    pooled = pooled3.reshape(B, n_out)
    cla = jnp.transpose(cla_flat.reshape(n_out, B, T), (1, 0, 2))
    return pooled, cla


def init_conv1x1_params(key, n_in, n_out):
    """Matches init_layer: uniform(-scale, scale), scale = sqrt(2/n)*sqrt(3)."""
    n = n_in * 1 * 1
    std = math.sqrt(2.0 / n)
    scale = std * math.sqrt(3.0)
    # Conv2d weight (n_out, n_in, 1, 1) squeezed to (n_out, n_in).
    w = jax.random.uniform(key, (n_out, n_in), jnp.float32, -scale, scale)
    b = jnp.zeros((n_out,), jnp.float32)
    return w, b


if __name__ == "__main__":
    B, n_in, n_out, T = 8, 32, 16, 64

    key = jax.random.PRNGKey(0)
    k_x, k_att, k_cla = jax.random.split(key, 3)

    x = jax.random.normal(k_x, (B, n_in, T, 1), jnp.float32)
    w_att, b_att = init_conv1x1_params(k_att, n_in, n_out)
    w_cla, b_cla = init_conv1x1_params(k_cla, n_in, n_out)

    pooled, cla = attention_forward(
        x, w_att, b_att, w_cla, b_cla,
        att_activation="sigmoid", cla_activation="softmax")
    jax.block_until_ready((pooled, cla))

    # Reference check in plain JAX (PyTorch NCT layout).  The reference uses
    # the same bf16-quantized matmul inputs as the kernel so the comparison
    # isolates kernel structure; tolerance covers the approx EUP reciprocal.
    xr = x[..., 0].astype(jnp.bfloat16).astype(jnp.float32)   # (B, n_in, T)
    wa = w_att.astype(jnp.bfloat16).astype(jnp.float32)
    wc = w_cla.astype(jnp.bfloat16).astype(jnp.float32)
    att_r = jax.nn.sigmoid(
        jnp.einsum("oc,bct->bot", wa, xr) + b_att[None, :, None])
    cla_r = jax.nn.softmax(
        jnp.einsum("oc,bct->bot", wc, xr) + b_cla[None, :, None], axis=1)
    att_r = jnp.clip(att_r, 1e-07, 1.0 - 1e-07)
    norm_att = att_r / jnp.sum(att_r, axis=2, keepdims=True)
    pooled_r = jnp.sum(norm_att * cla_r, axis=2)               # (B, n_out)

    assert pooled.shape == (B, n_out) and cla.shape == (B, n_out, T)
    assert jnp.allclose(cla, cla_r, atol=1e-2, rtol=1e-2)
    assert jnp.allclose(pooled, pooled_r, atol=1e-2, rtol=1e-2)

    print("KERNEL_OK")
</pallas_src>

<mosaic_0001>
module attributes {stable_mosaic.version = 11 : i64} {
  func.func @attention_kernel(%arg0: i32, %arg1: memref<32x128xbf16, #tpu.memory_space<vmem>>, %arg2: memref<32x32xbf16, #tpu.memory_space<vmem>>, %arg3: memref<32x1xf32, #tpu.memory_space<vmem>>, %arg4: memref<128x2xf32, #tpu.memory_space<vmem>>, %arg5: memref<1x2x16xf32, #tpu.memory_space<vmem>>, %arg6: memref<16x128xf32, #tpu.memory_space<vmem>>) attributes {dimension_semantics = [#tpu.dimension_semantics<parallel>], iteration_bounds = array<i64: 4>, scalar_prefetch = 0 : i64, scratch_operands = 0 : i64, tpu.core_type = #tpu.core_type<tc>, window_params = [{transform_indices = @transform_0, window_bounds = array<i64: 32, 128>}, {pipeline_mode = #tpu.pipeline_mode<synchronous>, transform_indices = @transform_1, window_bounds = array<i64: 32, 32>}, {pipeline_mode = #tpu.pipeline_mode<synchronous>, transform_indices = @transform_2, window_bounds = array<i64: 32, 1>}, {pipeline_mode = #tpu.pipeline_mode<synchronous>, transform_indices = @transform_3, window_bounds = array<i64: 128, 2>}, {transform_indices = @transform_4, window_bounds = array<i64: 1, 2, 16>}, {transform_indices = @transform_5, window_bounds = array<i64: 16, 128>}]} {
    %c0 = arith.constant 0 : index
    %c0_0 = arith.constant 0 : index
    %0 = vector.load %arg2[%c0, %c0_0] : memref<32x32xbf16, #tpu.memory_space<vmem>>, vector<32x32xbf16>
    %c0_1 = arith.constant 0 : index
    %c0_2 = arith.constant 0 : index
    %1 = vector.load %arg1[%c0_1, %c0_2] : memref<32x128xbf16, #tpu.memory_space<vmem>>, vector<32x128xbf16>
    %cst = arith.constant dense<0.000000e+00> : vector<32x128xf32>
    %2 = tpu.matmul %0, %1, %cst {dimension_numbers = #tpu.dot_dimension_numbers<[1], [0], [0], [1], [0, 0, 1, 1], [], []>} : vector<32x32xbf16>, vector<32x128xbf16>, vector<32x128xf32> -> vector<32x128xf32>
    %c0_3 = arith.constant 0 : index
    %c0_4 = arith.constant 0 : index
    %3 = vector.load %arg3[%c0_3, %c0_4] : memref<32x1xf32, #tpu.memory_space<vmem>>, vector<32x1xf32>
    %4 = vector.broadcast %3 : vector<32x1xf32> to vector<32x128xf32>
    %5 = arith.addf %2, %4 : vector<32x128xf32>
    %6 = vector.extract_strided_slice %5 {offsets = [0, 0], sizes = [16, 128], strides = [1, 1]} : vector<32x128xf32> to vector<16x128xf32>
    %7 = arith.negf %6 : vector<16x128xf32>
    %8 = math.exp %7 : vector<16x128xf32>
    %cst_5 = arith.constant 1.000000e+00 : f32
    %9 = vector.broadcast %cst_5 : f32 to vector<16x128xf32>
    %10 = arith.addf %9, %8 : vector<16x128xf32>
    %11 = arith.divf %9, %10 : vector<16x128xf32>
    %12 = vector.extract_strided_slice %5 {offsets = [16, 0], sizes = [16, 128], strides = [1, 1]} : vector<32x128xf32> to vector<16x128xf32>
    %cst_6 = arith.constant dense<0xFF800000> : vector<128xf32>
    %13 = vector.multi_reduction <maximumf>, %12, %cst_6 [0] : vector<16x128xf32> to vector<128xf32>
    %14 = vector.shape_cast %13 : vector<128xf32> to vector<1x128xf32>
    %15 = vector.broadcast %14 : vector<1x128xf32> to vector<16x128xf32>
    %16 = arith.subf %12, %15 : vector<16x128xf32>
    %17 = math.exp %16 : vector<16x128xf32>
    %cst_7 = arith.constant dense<0.000000e+00> : vector<128xf32>
    %18 = vector.multi_reduction <add>, %17, %cst_7 [0] : vector<16x128xf32> to vector<128xf32>
    %19 = vector.shape_cast %18 : vector<128xf32> to vector<1x128xf32>
    %20 = tpu.reciprocal %19 : vector<1x128xf32> -> vector<1x128xf32>
    %21 = vector.broadcast %20 : vector<1x128xf32> to vector<16x128xf32>
    %22 = arith.mulf %17, %21 : vector<16x128xf32>
    %c0_8 = arith.constant 0 : index
    %c0_9 = arith.constant 0 : index
    %23 = vector.load %arg6[%c0_8, %c0_9] : memref<16x128xf32, #tpu.memory_space<vmem>>, vector<16x128xf32>
    tpu.vector_store %arg6[%c0_8, %c0_9], %22 {strides = array<i32>} : memref<16x128xf32, #tpu.memory_space<vmem>>, vector<16x128xf32>,
    %cst_10 = arith.constant 1.000000e-07 : f32
    %cst_11 = arith.constant 0.99999988 : f32
    %24 = vector.broadcast %cst_10 : f32 to vector<16x128xf32>
    %25 = arith.maximumf %24, %11 : vector<16x128xf32>
    %26 = vector.broadcast %cst_11 : f32 to vector<16x128xf32>
    %27 = arith.minimumf %26, %25 : vector<16x128xf32>
    %c0_12 = arith.constant 0 : index
    %c0_13 = arith.constant 0 : index
    %28 = vector.load %arg4[%c0_12, %c0_13] : memref<128x2xf32, #tpu.memory_space<vmem>>, vector<128x2xf32>
    %29 = arith.mulf %27, %22 : vector<16x128xf32>
    %cst_14 = arith.constant dense<0.000000e+00> : vector<16x2xf32>
    %30 = tpu.matmul %29, %28, %cst_14 {dimension_numbers = #tpu.dot_dimension_numbers<[1], [0], [0], [1], [0, 0, 1, 1], [], []>} : vector<16x128xf32>, vector<128x2xf32>, vector<16x2xf32> -> vector<16x2xf32>
    %cst_15 = arith.constant dense<0.000000e+00> : vector<16x2xf32>
    %31 = tpu.matmul %27, %28, %cst_15 {dimension_numbers = #tpu.dot_dimension_numbers<[1], [0], [0], [1], [0, 0, 1, 1], [], []>} : vector<16x128xf32>, vector<128x2xf32>, vector<16x2xf32> -> vector<16x2xf32>
    %32 = tpu.reciprocal %31 {approx = true} : vector<16x2xf32> -> vector<16x2xf32>
    %33 = arith.mulf %30, %32 : vector<16x2xf32>
    %34 = tpu.transpose %33, [1, 0] : vector<16x2xf32> -> vector<2x16xf32>
    %c0_16 = arith.constant 0 : index
    %c0_17 = arith.constant 0 : index
    %c0_18 = arith.constant 0 : index
    %35 = vector.load %arg5[%c0_16, %c0_17, %c0_18] : memref<1x2x16xf32, #tpu.memory_space<vmem>>, vector<1x2x16xf32>
    %36 = vector.shape_cast %35 : vector<1x2x16xf32> to vector<2x16xf32>
    %37 = vector.shape_cast %34 : vector<2x16xf32> to vector<1x2x16xf32>
    tpu.vector_store %arg5[%c0_16, %c0_17, %c0_18], %37 {strides = array<i32>} : memref<1x2x16xf32, #tpu.memory_space<vmem>>, vector<1x2x16xf32>,
    return
  }
  func.func @transform_0(%arg0: i32) -> (i32, i32) {
    %c0_i32 = arith.constant 0 : i32
    %c0_i32_0 = arith.constant 0 : i32
    return %c0_i32, %arg0 : i32, i32
  }
  func.func @transform_1(%arg0: i32) -> (i32, i32) {
    %c0_i32 = arith.constant 0 : i32
    %c0_i32_0 = arith.constant 0 : i32
    %c0_i32_1 = arith.constant 0 : i32
    return %c0_i32, %c0_i32_0 : i32, i32
  }
  func.func @transform_2(%arg0: i32) -> (i32, i32) {
    %c0_i32 = arith.constant 0 : i32
    %c0_i32_0 = arith.constant 0 : i32
    %c0_i32_1 = arith.constant 0 : i32
    return %c0_i32, %c0_i32_0 : i32, i32
  }
  func.func @transform_3(%arg0: i32) -> (i32, i32) {
    %c0_i32 = arith.constant 0 : i32
    %c0_i32_0 = arith.constant 0 : i32
    %c0_i32_1 = arith.constant 0 : i32
    return %c0_i32, %c0_i32_0 : i32, i32
  }
  func.func @transform_4(%arg0: i32) -> (i32, i32, i32) {
    %c0_i32 = arith.constant 0 : i32
    %c0_i32_0 = arith.constant 0 : i32
    %c0_i32_1 = arith.constant 0 : i32
    return %arg0, %c0_i32, %c0_i32_0 : i32, i32, i32
  }
  func.func @transform_5(%arg0: i32) -> (i32, i32) {
    %c0_i32 = arith.constant 0 : i32
    %c0_i32_0 = arith.constant 0 : i32
    return %c0_i32, %arg0 : i32, i32
  }
}

</mosaic_0001>

<bundles_post_ra>
// kernel: tpu_custom_call.1
= control target key start
LH: loop header
LB: loop body
LE: loop exit
PB: predicated region body
PF: predicated region fallthrough
CT: control target
= control target key end

     0   :  { %11 = vsyncpa [#allocation4], 0  ;;  %s1397_s0 = inlined_call_operand.vmem [shape: bf16[32,512], index: 0, kind: input, shape index: {}]   ;;  %s1398_s1 = inlined_call_operand.vmem [shape: bf16[32,32], index: 1, kind: input, shape index: {}]   ;;  %s1399_s2 = inlined_call_operand.vmem [shape: f32[32,1], index: 2, kind: input, shape index: {}]   ;;  %s1400_s3 = inlined_call_operand.vmem [shape: f32[128,2], index: 3, kind: input, shape index: {}]   ;;  %s1401_s4 = inlined_call_operand.hbm [shape: f32[4,2,16], index: 4, kind: output, shape index: {0}]   ;;  %s1402_s5 = inlined_call_operand.hbm [shape: f32[16,512], index: 5, kind: output, shape index: {1}]  }
   0x1   :  { %13 = vsyncpa [#allocation4 + $0x1], 0 }
   0x2   :  { %14 = vsyncpa [#allocation6], 0 }
   0x3   :  { %16 = vsyncpa [#allocation6 + $0x1], 0  ;;  %s1186_s18 = smov 0   ;;  %s1188_s19 = smov 0  }
   0x4   :  { %s1190_s20 = smov 0   ;;  %s1192_s21 = smov 0  }
   0x5 LB: > { %s1207_s22 = sadd.s32 4294967295, %s1148_s21   ;;  %s776_s23 = sadd.s32 4294967294, %s1148_s21   ;;  %s1148_s21 = sphi %s1192_s21, %s1408_s21   ;;  %s1144_s20 = sphi %s1190_s20, %s1407_s20   ;;  %s1140_s19 = sphi %s1188_s19, %s1406_s19   ;;  %s1136_s18 = sphi %s1186_s18, %s1405_s18  }
   0x6   : > { %s1211_s24 = sadd.s32 1, %s1148_s21   ;;  %s29_s25 = sadd.s32 1, %s1144_s20 }
   0x7   : > { %s26_s26 = ssub.s32 %s1148_s21, %s1211_s24  ;;  %p36_p0 = scmp.ne.s32.totalorder %s1144_s20, %s1140_s19 }
   0x8   : > { %p27_p1 = scmp.eq.s32.totalorder %s26_s26, 0  ;;  %p37_p2 = scmp.eq.s32.totalorder %s1148_s21, 0 }
   0x9   : > { %p129_p3 = scmp.eq.s32.totalorder %s1207_s22, 3  ;;  %p134_p4 = scmp.ne.s32.totalorder %s1140_s19, %s1136_s18 }
   0xa   : > { %s1223_s27 = scalar_select %p27_p1, %s1144_s20, %s29_s25  }
   0xb   : > { %p38_p5 = por %p37_p2, %p36_p0  ;;  %p1225_p6 = por %p129_p3, %p36_p0 }
   0xc   : > { %p135_p7 = scmp.eq.s32.totalorder %s776_s23, 3  ;;  %p778_p9 = scmp.ge.s32.totalorder %s1148_s21, 4 }
   0xe   : > { %p1229_p8 = por %p135_p7, %p134_p4  ;;  %186 = sbr.rel (%p778_p9) target bundleno = 28 (0x1c), region = 28 }
  0x15   : > { %189 = sbr.rel (!%p38_p5) target bundleno = 28 (0x1c), region = 32  ;;  %s191_s30 = sand.u32 (%p38_p5), 1, %s1144_s20  }
  0x16   : > { %s780_s6 = sshll.u32 (%p38_p5), %s1148_s21, 2  ;;  %s779_s7 = sshll.u32 (%p38_p5), %s191_s30, 4 }
  0x17   : > { %s195_s10 = scalar_lea.vmem (%p38_p5), %s1397_s0, %s780_s6  ;;  %s193_s11 = scalar_lea.vmem (%p38_p5), [#allocation2], %s779_s7 }
  0x18   : > { %v211_v0 = vld [vmem:[%s195_s10] sm:$0xf] (%p38_p5)  ;;  %v213_v1 = vld [vmem:[%s195_s10 + $0x10] sm:$0xf] (%p38_p5) }
  0x19   : > { %212 = vst [vmem:[%s193_s11] sm:$0xf] (%p38_p5), %v211_v0  ;;  %214 = vst [vmem:[%s193_s11 + $0x4] sm:$0xf] (%p38_p5), %v213_v1  ;;  %v215_v2 = vld [vmem:[%s195_s10 + $0x20] sm:$0xf] (%p38_p5) }
  0x1a   : > { %v217_v3 = vld [vmem:[%s195_s10 + $0x30] sm:$0xf] (%p38_p5)  ;;  %216 = vst [vmem:[%s193_s11 + $0x8] sm:$0xf] (%p38_p5), %v215_v2 }
  0x1b   : > { %218 = vst [vmem:[%s193_s11 + $0xc] sm:$0xf] (%p38_p5), %v217_v3 }
  0x1c PF: > { %p781_p10 = scmp.ge.s32.totalorder %s1148_s21, 1  ;;  %p248_p11 = scmp.lt.s32.totalorder %s1148_s21, 5 }
  0x1e   : > { %p249_p12 = pnand %p781_p10, %p248_p11 }
  0x1f   : > { %s1242_s12 = sand.u32 (!%p249_p12), 1, %s1140_s19   ;;  %v1034_v4 = vld [vmem:[%s1398_s1] sm:$0xff] (!%p249_p12)   ;;  %vm342_vm0 = vcmask (!%p249_p12), 261120   ;;  %v298_v5 = vld [vmem:[%s1399_s2 + $0x10] sm:$0xff] (!%p249_p12)  ;;  %v1150_v7 = vmov (!%p249_p12), 0   ;;  %v299_v9 = vld [vmem:[%s1399_s2 + $0x18] sm:$0xff] (!%p249_p12) }
  0x20   : > { %252 = sbr.rel (%p249_p12) target bundleno = 677 (0x2a5), region = 73  ;;  %s782_s15 = sshll.u32 (!%p249_p12), %s1242_s12, 4  ;;  %843 = vmatprep.mubr.msk.bf16.mxu0 (!%p249_p12), %vm342_vm0, %v1034_v4  ;;  %1030 = vset.pattern.permute.xlu0 (!%p249_p12), %v1150_v7  ;;  %v296_v10 = vld [vmem:[%s1399_s2] sm:$0xff] (!%p249_p12)  ;;  %v297_v11 = vld [vmem:[%s1399_s2 + $0x8] sm:$0xff] (!%p249_p12)  ;;  %v441_v16 = vld [vmem:[%s1400_s3 + $0x10] sm:$0xff] (!%p249_p12) }
  0x21   : > { %s257_s23 = scalar_lea.vmem (!%p249_p12), [#allocation2], %s782_s15  ;;  %1031 = vset.pattern.permute.xlu1 (!%p249_p12), %v1150_v7  ;;  %312 = vperm.xlu0 (!%p249_p12), %1030, %v298_v5   ;;  %v1035_v12 = vld [vmem:[%s1398_s1 + $0x8] sm:$0xff] (!%p249_p12)   ;;  %v439_v13 = vld [vmem:[%s1400_s3] sm:$0xff] (!%p249_p12)  ;;  %v442_v17 = vld [vmem:[%s1400_s3 + $0x18] sm:$0xff] (!%p249_p12)  ;;  %s286_s17 = scalar_lea.vmem (!%p249_p12), [#allocation5], %s782_s15 }
  0x22   : > { %v1032_v6 = vld [vmem:[%s257_s23] sm:$0xff] (!%p249_p12)   ;;  %v1033_v8 = vld [vmem:[%s257_s23 + $0x8] sm:$0xff] (!%p249_p12)   ;;  %302 = vperm.xlu1 (!%p249_p12), %1031, %v296_v10   ;;  %v921_v18 = vpack.c.bf16 (!%p249_p12), %v442_v17, %v441_v16  ;;  %s676_s15 = sshll.u32 (!%p249_p12), %s286_s17, 4  ;;  %s796_s23 = sshll.u32 (!%p249_p12), %s1207_s22, 7  ;;  %s1317_s15 = int_to_ptr.vmem [resolvable:$true] %s676_s15 }
  0x23   : > { %839 = vmatprep.subr.bf16.mxu0 (!%p249_p12), %v1032_v6  ;;  %v440_v14 = vld [vmem:[%s1400_s3 + $0x8] sm:$0xff] (!%p249_p12)  ;;  %v443_v19 = vld [vmem:[%s1400_s3 + $0x20] sm:$0xff] (!%p249_p12)  ;;  %v445_v22 = vld [vmem:[%s1400_s3 + $0x30] sm:$0xff] (!%p249_p12)  ;;  %s1323_s30 = scalar_lea.hbm (!%p249_p12), %s1402_s5, %s796_s23  ;;  %s651_s6 = scalar_lea.sflag (!%p249_p12), [#allocation6], %s1242_s12 }
  0x24   : > { %840 = vmatpush3.bf16.msra.mxu0 (!%p249_p12), %v1032_v6  ;;  %v917_v15 = vpack.c.bf16 (!%p249_p12), %v440_v14, %v439_v13  ;;  %v444_v20 = vld [vmem:[%s1400_s3 + $0x28] sm:$0xff] (!%p249_p12)  ;;  %v446_v23 = vld [vmem:[%s1400_s3 + $0x38] sm:$0xff] (!%p249_p12)  ;;  %v447_v25 = vld [vmem:[%s1400_s3 + $0x40] sm:$0xff] (!%p249_p12)  ;;  %s1054_s7 = scalar_lea.vmem (!%p249_p12), %s1317_s15, 256  ;;  %s1151_s8 = smov (!%p249_p12), [#allocation5]  }
  0x25   : > { %841 = vmatprep.subr.bf16.mxu0 (!%p249_p12), %v1033_v8  ;;  %317 = vperm.xlu0 (!%p249_p12), %1030, %v299_v9   ;;  %v925_v21 = vpack.c.bf16 (!%p249_p12), %v444_v20, %v443_v19  ;;  %v929_v24 = vpack.c.bf16 (!%p249_p12), %v446_v23, %v445_v22  ;;  %v448_v26 = vld [vmem:[%s1400_s3 + $0x48] sm:$0xff] (!%p249_p12)  ;;  %v449_v28 = vld [vmem:[%s1400_s3 + $0x50] sm:$0xff] (!%p249_p12)  ;;  %v450_v29 = vld [vmem:[%s1400_s3 + $0x58] sm:$0xff] (!%p249_p12)  ;;  %p1055_p13 = scmp.ne.s32.totalorder (!%p249_p12), %s1317_s15, %s1054_s7  ;;  %s1058_s9 = sshll.u32 (!%p249_p12), %s1151_s8, 4  ;;  %s1059_s9 = int_to_ptr.vmem [resolvable:$false] %s1058_s9 }
  0x26   : > { %307 = vperm.xlu1 (!%p249_p12), %1031, %v297_v11   ;;  %918 = vmatprep.subr.bf16.mxu1 (!%p249_p12), %v917_v15  ;;  %v933_v27 = vpack.c.bf16 (!%p249_p12), %v448_v26, %v447_v25  ;;  %v937_v30 = vpack.c.bf16 (!%p249_p12), %v450_v29, %v449_v28  ;;  %v451_v31 = vld [vmem:[%s1400_s3 + $0x60] sm:$0xff] (!%p249_p12)  ;;  %v452_v32 = vld [vmem:[%s1400_s3 + $0x68] sm:$0xff] (!%p249_p12)  ;;  %v453_v34 = vld [vmem:[%s1400_s3 + $0x70] sm:$0xff] (!%p249_p12)  ;;  %s1060_s10 = scalar_lea.vmem (!%p249_p12), %s1059_s9, 512  ;;  %p1061_p2 = scmp.lt.s32.totalorder (!%p249_p12), %s1317_s15, %s1059_s9 }
  0x27   : > { %920 = vmatpush3.bf16.msra.mxu1 %v917_v15  ;;  %v941_v33 = vpack.c.bf16 %v452_v32, %v451_v31  ;;  %v454_v35 = vld [vmem:[%s1400_s3 + $0x78] sm:$0xff]  ;;  %p1056_p0 = pnand %p1055_p13, %p1225_p6  ;;  %p1062_p3 = scmp.lt.s32.totalorder %s1060_s10, %s1054_s7 }
  0x28   : > { %842 = vmatpush3.bf16.msra.mxu0 %v1033_v8  ;;  %922 = vmatprep.subr.bf16.mxu1 %v921_v18  ;;  %v945_v36 = vpack.c.bf16 %v454_v35, %v453_v34 }
  0x29   : > { %950 = vmatprep.subr.bf16.mxu0 %v917_v15  ;;  %p1057_p1 = pneg %p1056_p0  ;;  %p1063_p4 = por %p1062_p3, %p1061_p2 }
  0x2b   : > { %844 = vmatmul.mubr.msk.bf16.vlgmr.msra.gmra.mrb[0].mxu0 %vm342_vm0, %v1035_v12  ;;  %924 = vmatpush3.bf16.msra.mxu1 %v921_v18  ;;  %p1064_p5 = pnand %p1063_p4, %p1057_p1 }
  0x2c   : > { %952 = vmatpush3.bf16.msra.mxu0 %v917_v15  ;;  %926 = vmatprep.subr.bf16.mxu1 %v925_v21 }
  0x2d   : > { %954 = vmatprep.subr.bf16.mxu0 %v921_v18 }
  0x2f   : > { %928 = vmatpush3.bf16.msra.mxu1 %v925_v21 }
  0x30   : > { %956 = vmatpush3.bf16.msra.mxu0 %v921_v18  ;;  %930 = vmatprep.subr.bf16.mxu1 %v929_v24 }
  0x31   : > { %958 = vmatprep.subr.bf16.mxu0 %v925_v21 }
  0x33   : > { %932 = vmatpush3.bf16.msra.mxu1 %v929_v24 }
  0x34   : > { %960 = vmatpush3.bf16.msra.mxu0 %v925_v21  ;;  %934 = vmatprep.subr.bf16.mxu1 %v933_v27 }
  0x35   : > { %962 = vmatprep.subr.bf16.mxu0 %v929_v24 }
  0x37   : > { %936 = vmatpush3.bf16.msra.mxu1 %v933_v27 }
  0x38   : > { %964 = vmatpush3.bf16.msra.mxu0 %v929_v24  ;;  %938 = vmatprep.subr.bf16.mxu1 %v937_v30 }
  0x39   : > { %966 = vmatprep.subr.bf16.mxu0 %v933_v27 }
  0x3b   : > { %940 = vmatpush3.bf16.msra.mxu1 %v937_v30 }
  0x3c   : > { %968 = vmatpush3.bf16.msra.mxu0 %v933_v27  ;;  %942 = vmatprep.subr.bf16.mxu1 %v941_v33 }
  0x3d   : > { %970 = vmatprep.subr.bf16.mxu0 %v937_v30 }
  0x3f   : > { %944 = vmatpush3.bf16.msra.mxu1 %v941_v33 }
  0x40   : > { %972 = vmatpush3.bf16.msra.mxu0 %v937_v30  ;;  %946 = vmatprep.subr.bf16.mxu1 %v945_v36 }
  0x41   : > { %974 = vmatprep.subr.bf16.mxu0 %v941_v33 }
  0x43   : > { %948 = vmatpush3.bf16.msra.mxu1 %v945_v36 }
  0x44   : > { %976 = vmatpush3.bf16.msra.mxu0 %v941_v33 }
  0x45   : > { %978 = vmatprep.subr.bf16.mxu0 %v945_v36 }
  0x48   : > { %980 = vmatpush3.bf16.msra.mxu0 %v945_v36 }
  0xa0   : > { %v313_v38 = vpop.permute.xlu0 %312 }
  0xa1   : > { %v303_v37 = vpop.permute.xlu1 %302 }
  0xa4   : > { %v318_v42 = vpop.permute.xlu0 %317 }
  0xa5   : > { %v308_v41 = vpop.permute.xlu1 %307 }
  0xfe   : > { %v845_v39 = vpop.f32.mrb[0].mxu0 }
  0xff   : > { %v383_v40 = vpop.f32.mrb[1].mxu0  ;;  %v392_v45 = vadd.f32 %v845_v39, %v313_v38 }
 0x100   : > { %v384_v43 = vadd.f32 %v383_v40, %v303_v37  ;;  %v846_v44 = vpop.f32.mrb[2].mxu0 }
 0x101   : > { %v395_v46 = vadd.f32 %v846_v44, %v318_v42  ;;  %v386_v47 = vpop.f32.mrb[3].mxu0 }
 0x102   : > { %v791_v48 = vmul.f32 -1.442695, %v384_v43  ;;  %v387_v49 = vadd.f32 %v386_v47, %v308_v41 }
 0x103   : > { %v410_v50 = vmax.f32 %v392_v45, %v395_v46 }
 0x104   : > { %1036 = vpow2.f32 %v791_v48  ;;  %v792_v51 = vmul.f32 -1.442695, %v387_v49 }
 0x105   : > { %v411_v52 = vrot.slane %v410_v50, 4 }
 0x106   : > { %1038 = vpow2.f32 %v792_v51 }
 0x107   : > { %v412_v53 = vmax.f32 %v410_v50, %v411_v52 }
 0x109   : > { %v413_v54 = vrot.slane %v412_v53, 2 }
 0x10b   : > { %v414_v55 = vmax.f32 %v412_v53, %v413_v54 }
 0x10d   : > { %v415_v56 = vrot.slane %v414_v55, 1 }
 0x10e   : > { %v1037_v57 = vpop.eup %1036 }
 0x10f   : > { %v404_v58 = vadd.f32 1.0, %v1037_v57  ;;  %v416_v59 = vmax.f32 %v414_v55, %v415_v56 }
 0x110   : > { %v1039_v60 = vpop.eup %1038 }
 0x111   : > { %1040 = vrcp.f32 %v404_v58  ;;  %v417_v61 = vsub.f32 %v392_v45, %v416_v59  ;;  %v418_v62 = vsub.f32 %v395_v46, %v416_v59  ;;  %v405_v63 = vadd.f32 1.0, %v1039_v60 }
 0x113   : > { %v419_v0 = vmul.f32 1.442695, %v417_v61  ;;  %v421_v1 = vmul.f32 1.442695, %v418_v62  ;;  %1042 = vrcp.f32 %v405_v63 }
 0x115   : > { %1044 = vpow2.f32 %v419_v0 }
 0x116   : > { %1046 = vpow2.f32 %v421_v1 }
 0x11b   : > { %v1041_v2 = vpop.eup %1040 }
 0x11c   : > { %v435_v3 = vmax.f32 %v1041_v2, 1e-07 }
 0x11d   : > { %v1043_v4 = vpop.eup %1042 }
 0x11e   : > { %v436_v5 = vmax.f32 %v1043_v4, 1e-07  ;;  %v437_v6 = vmin.f32 %v435_v3, 0.9999999 }
 0x11f   : > { %v1045_v7 = vpop.eup %1044 }
 0x120   : > { %v1047_v8 = vpop.eup %1046  ;;  %914 = vmatprep.mubr.f32.mxu0 %v437_v6  ;;  %v438_v9 = vmin.f32 %v436_v5, 0.9999999 }
 0x121   : > { %v423_v10 = vadd.f32 %v1047_v8, %v1045_v7 }
 0x122   : > { %915 = vmatmul.mubr.f32.vlgmr.msra.gmra.mrb[4].mxu0 %v438_v9 }
 0x123   : > { %v424_v11 = vrot.slane %v423_v10, 4 }
 0x125   : > { %v425_v12 = vadd.f32 %v424_v11, %v423_v10 }
 0x127   : > { %v426_v13 = vrot.slane %v425_v12, 2 }
 0x129   : > { %v427_v14 = vadd.f32 %v426_v13, %v425_v12 }
 0x12b   : > { %v428_v15 = vrot.slane %v427_v14, 1 }
 0x12d   : > { %v429_v16 = vadd.f32 %v428_v15, %v427_v14 }
 0x12f   : > { %1048 = vrcp.f32 %v429_v16 }
 0x139   : > { %v1049_v17 = vpop.eup %1048 }
 0x13a   : > { %v431_v18 = vmul.f32 %v1049_v17, %v1045_v7  ;;  %v432_v19 = vmul.f32 %v1049_v17, %v1047_v8 }
 0x13c   : > { %433 = vst [vmem:[%s286_s17] sm:$0xff] %v431_v18  ;;  %v455_v20 = vmul.f32 %v437_v6, %v431_v18  ;;  %434 = vst [vmem:[%s286_s17 + $0x8] sm:$0xff] %v432_v19  ;;  %v456_v21 = vmul.f32 %v438_v9, %v432_v19 }
 0x13e   : > { %879 = vmatprep.mubr.f32.mxu1 %v455_v20 }
 0x13f   : > { %880 = vmatmul.mubr.f32.vlgmr.msra.gmra.mrb[0].mxu1 %v456_v21 }
 0x1f5   : > { %v916_v22 = vpop.f32.mrb[4].mxu0 }
 0x1f6   : > { %v598_v23 = vpop.f32.mrb[5].mxu0  ;;  %1050 = vrcp.f32 %v916_v22 }
 0x1f7   : > { %1052 = vrcp.f32 %v598_v23 }
 0x200   : > { %v1051_v24 = vpop.eup %1050 }
 0x201   : > { %v1053_v26 = vpop.eup %1052 }
 0x212   : > { %v881_v25 = vpop.f32.mrb[0].mxu1 }
 0x213   : > { %v610_v27 = vmul.f32 %v1051_v24, %v881_v25  ;;  %v523_v28 = vpop.f32.mrb[1].mxu1 }
 0x214   : > { %v609_v29 = vmul.f32 %v1053_v26, %v523_v28 }
 0x216   : > { %611 = vxpose.xlu0.b32.start [1/2] (short) (narrow) %v609_v29, 8 }
 0x21a   : > { %612 = vxpose.xlu0.b32.end [2/2] (short) (narrow) %v610_v27, 8 }
 0x21b   : > { %1067 = shalt.err (!%p1064_p5)
}
 0x21c   : > { %s1068_s11 = scalar_lea.hbm %s1323_s30, 256  ;;  %s1072_s16 = scalar_lea.hbm %s1402_s5, 1024 }
 0x21d   : > { %p1069_p7 = scmp.ne.s32.totalorder %s1323_s30, %s1068_s11  ;;  %p1073_p11 = scmp.lt.u32.totalorder %s1323_s30, %s1402_s5 }
 0x21e   : > { %p1074_p12 = scmp.lt.u32.totalorder %s1072_s16, %s1068_s11  ;;  %p1076_p0 = scmp.lt.u32.totalorder %s1068_s11, %s1323_s30 }
 0x21f   : > { %p1070_p9 = pnand %p1069_p7, %p1225_p6 }
 0x220   : > { %p1075_p13 = por %p1074_p12, %p1073_p11 }
 0x221   : > { %p1071_p10 = pneg %p1070_p9 }
 0x222   : > { %p1077_p1 = por %p1076_p0, %p1075_p13 }
 0x224   : > { %p1078_p2 = pnand %p1077_p1, %p1071_p10 }
 0x226   : > { %1081 = shalt.err (!%p1078_p2)
}
 0x227   : > { %s1152_s25 = smov 128   ;;  %s1153_s26 = smov 512   ;;  %vm643_vm1 = vcmask 123904  }
 0x228   : > { %s1154_s7 = smov 8   ;;  %s783_s8 = sshll.u32 %s1242_s12, 1 }
 0x229   : > { %982 = dma.vmem_to_hbm [thread:$0]  (%p1225_p6), %s1317_s15, 256, %s1323_s30, %s651_s6, %s1152_s25, %s1153_s26, %s1154_s7  }
 0x22a   : > { %s795_s9 = sshll.u32 %s1207_s22, 5  ;;  %s279_s10 = scalar_lea.vmem [#allocation3], %s783_s8 }
 0x22b   : > { %s664_s11 = sshll.u32 %s279_s10, 4  ;;  %s1354_s16 = scalar_lea.hbm %s1401_s4, %s795_s9  ;;  %s1356_s11 = int_to_ptr.vmem [resolvable:$true] %s664_s11 }
 0x22c   : > { %s646_s17 = scalar_lea.sflag [#allocation4], %s1242_s12  ;;  %s1082_s23 = scalar_lea.vmem %s1356_s11, 32 }
 0x22d   : > { %p1083_p3 = scmp.ne.s32.totalorder %s1356_s11, %s1082_s23  ;;  %s1155_s22 = smov [#allocation3]  }
 0x22e   : > { %s1086_s15 = sshll.u32 %s1155_s22, 4  ;;  %s1087_s15 = int_to_ptr.vmem [resolvable:$false] %s1086_s15 }
 0x22f   : > { %p1084_p4 = pnand %p1083_p3, %p1225_p6  ;;  %s1088_s30 = scalar_lea.vmem %s1087_s15, 64 }
 0x230   : > { %p1089_p7 = scmp.lt.s32.totalorder %s1356_s11, %s1087_s15  ;;  %p1090_p9 = scmp.lt.s32.totalorder %s1088_s30, %s1082_s23 }
 0x231   : > { %p1085_p5 = pneg %p1084_p4 }
 0x232   : > { %p1091_p10 = por %p1090_p9, %p1089_p7 }
 0x234   : > { %p1092_p11 = pnand %p1091_p10, %p1085_p5 }
 0x296   : > { %v627_v30 = vpop.trf.xlu0 }
 0x297   : > { %644 = vst.msk [vmem:[%s279_s10] sm:$0x3] %vm643_vm1, %v627_v30 }
 0x298   : > { %1095 = shalt.err (!%p1092_p11)
}
 0x299   : > { %s1096_s12 = scalar_lea.hbm %s1354_s16, 32  ;;  %s1100_s26 = scalar_lea.hbm %s1401_s4, 128 }
 0x29a   : > { %p1097_p12 = scmp.ne.s32.totalorder %s1354_s16, %s1096_s12  ;;  %p1101_p1 = scmp.lt.u32.totalorder %s1354_s16, %s1401_s4 }
 0x29b   : > { %p1102_p2 = scmp.lt.u32.totalorder %s1100_s26, %s1096_s12  ;;  %p1104_p4 = scmp.lt.u32.totalorder %s1096_s12, %s1354_s16 }
 0x29c   : > { %p1098_p13 = pnand %p1097_p12, %p1225_p6 }
 0x29d   : > { %p1103_p3 = por %p1102_p2, %p1101_p1 }
 0x29e   : > { %p1099_p0 = pneg %p1098_p13 }
 0x29f   : > { %p1105_p5 = por %p1104_p4, %p1103_p3 }
 0x2a1   : > { %p1106_p7 = pnand %p1105_p5, %p1099_p0 }
 0x2a3   : > { %1109 = shalt.err (!%p1106_p7)
}
 0x2a4   : > { %981 = dma.vmem_to_hbm [thread:$0]  (%p1225_p6), %s1356_s11, 32, %s1354_s16, %s646_s17  }
 0x2a5 PF: > { %p992_p9 = scmp.ge.s32.totalorder %s1148_s21, 2  ;;  %s691_s9 = sand.u32 1, %s1136_s18  }
 0x2a6   : > { %s692_s10 = scalar_lea.sflag [#allocation4], %s691_s9 }
 0x2a7   : > { %p986_p10 = pnand %p992_p9, %p1229_p8 }
 0x2a9   : > { %1127 = dma.done.wait (!%p986_p10), %s692_s10, 32  }
 0x2aa   : > { %1129 = vsyncadd (!%p986_p10), %s692_s10, 4294967264  ;;  %s701_s13 = scalar_lea.sflag [#allocation6], %s691_s9 }
 0x2ab   : > { %1131 = dma.done.wait (!%p986_p10), %s701_s13, 256  }
 0x2ac   : > { %1133 = vsyncadd (!%p986_p10), %s701_s13, 4294967040  ;;  %p19_p6 = scmp.ge.s32.totalorder %s1211_s24, 6   ;;  %s1405_s18 = smov %s1140_s19 }
 0x2ad   : > { %s1406_s19 = smov %s1144_s20  ;;  %s1407_s20 = smov %s1223_s27 }
 0x2ae   : > { %s1408_s21 = smov %s1211_s24  ;;  %21 = sbr.rel (!%p19_p6) target bundleno = 5 (0x5), region = 134 }
 0x2b5   :  { %706 = vsyncpa [#allocation4], 1 }
 0x2b6   :  { %708 = vsyncpa [#allocation4 + $0x1], 1 }
 0x2b7   :  { %709 = vsyncpa [#allocation6], 1 }
 0x2b8   :  { %711 = vsyncpa [#allocation6 + $0x1], 1 }

</bundles_post_ra>
